<compile_context>
chip_gen: v6e
topology: v6e:2x2x1
jax: 0.10.0
libtpu: 0.0.40
codegen_flags: <defaults>
</compile_context>

<pallas_src>
import jax
import jax.numpy as jnp
from jax.experimental import pallas as pl
from jax.experimental.pallas import tpu as pltpu


NEG_SLOPE = 0.01  # torch.nn.LeakyReLU default negative_slope


def _leaky_relu(x):
    # slope < 1  =>  leaky_relu(x) == max(x, slope*x): 1 mul + 1 max on the VPU.
    return jnp.maximum(x, NEG_SLOPE * x)


def num_encoder_kernel(x_ref, w_ref, b_ref, o_ref):
    # x_ref: (K, TN)   feature-major input tile (batch on lanes)
    # w_ref: (F, K)    PyTorch [out, in] weight (full block, reused each step)
    # b_ref: (F, 1)    bias (lane-broadcast)
    # o_ref: (F, TN)   feature-major output tile (lane-dense stores)
    k_dim = x_ref.shape[0]
    # Unrolled K-term broadcast-FMA: (1, TN) * (F, 1) -> (F, TN) on the VPU.
    # Avoids a degenerate 8x5 MXU matmul and is exact f32.
    h = x_ref[0:1, :].astype(jnp.float32) * w_ref[:, 0:1]
    for k in range(1, k_dim):
        h = h + x_ref[k:k + 1, :].astype(jnp.float32) * w_ref[:, k:k + 1]
    h = h + b_ref[...]
    o_ref[...] = _leaky_relu(h).astype(o_ref.dtype)


def num_encoder_forward_fb(x_fb, params, *, tn=32768):
    """Feature-major entry point: x_fb (num_prop_size, N) -> (F_out, N).

    Use this inside a feature-major encoder stack to avoid per-call HBM
    transpose passes entirely (the kernel itself is HBM-bandwidth-bound).
    """
    w, b = params["w"], params["b"]
    f_out, f_in = w.shape
    k_dim, n = x_fb.shape
    assert k_dim == f_in

    if n <= tn:
        # Single full-extent block: always layout-legal, grid of 1.
        tn_eff, n_tiles = n, 1
    else:
        tn_eff = tn - (tn % 128) or 128        # lane tile must be a multiple of 128
        n_tiles = pl.cdiv(n, tn_eff)           # trailing ragged block: masked stores

    cost = pl.CostEstimate(
        flops=2 * f_in * f_out * n + 2 * f_out * n,
        bytes_accessed=(f_in + f_out) * 4 * n + (f_in + 1) * f_out * 4,
        transcendentals=0,
    )

    return pl.pallas_call(
        num_encoder_kernel,
        out_shape=jax.ShapeDtypeStruct((f_out, n), x_fb.dtype),
        grid_spec=pltpu.PrefetchScalarGridSpec(
            num_scalar_prefetch=0,
            grid=(n_tiles,),
            in_specs=[
                pl.BlockSpec((f_in, tn_eff), lambda i: (0, i)),   # x tile
                pl.BlockSpec((f_out, f_in), lambda i: (0, 0)),    # W (full)
                pl.BlockSpec((f_out, 1), lambda i: (0, 0)),       # b (full)
            ],
            out_specs=pl.BlockSpec((f_out, tn_eff), lambda i: (0, i)),
        ),
        compiler_params=pltpu.CompilerParams(
            dimension_semantics=("parallel",)),
        cost_estimate=cost,
    )(x_fb, w, b)


def num_encoder_forward(num_prop, params, *, tn=32768):
    """Torch-compatible entry point: num_prop (N, num_prop_size) -> (N, F_out).

    The two transposes below are pure relayout to match the torch interface;
    prefer `num_encoder_forward_fb` when the surrounding stack can stay in
    (feature, batch) layout and skip them.
    """
    out_fb = num_encoder_forward_fb(num_prop.T, params, tn=tn)
    return out_fb.T


def init_params(key, num_prop_size=5, embedding_dimension=32):
    """Deterministic synthetic params in PyTorch nn.Linear layout ([out, in])."""
    f_out = embedding_dimension // 4
    k_w, k_b = jax.random.split(key)
    return {
        "w": jax.random.normal(k_w, (f_out, num_prop_size), jnp.float32) * 0.3,
        "b": jax.random.normal(k_b, (f_out, 1), jnp.float32) * 0.1,
    }


def reference_forward(num_prop, p):
    # y = LeakyReLU(x @ W^T + b), matching nn.Linear + nn.LeakyReLU (f32-exact).
    h = jnp.dot(num_prop, p["w"].T, precision=jax.lax.Precision.HIGHEST)
    return _leaky_relu(h + p["b"].reshape(1, -1))


if __name__ == "__main__":
    key = jax.random.PRNGKey(0)
    k_x, k_x2, k_p = jax.random.split(key, 3)
    params = init_params(k_p)

    # Small batch: single full-extent block path.
    N = 16
    num_prop = jax.random.normal(k_x, (N, 5), jnp.float32)
    out = jax.block_until_ready(num_encoder_forward(num_prop, params))
    ref = reference_forward(num_prop, params)
    assert out.shape == (N, 8)
    assert jnp.allclose(out, ref, atol=1e-5, rtol=1e-5), "mismatch vs reference (small batch)"

    # Multi-tile + ragged trailing block path (small tn to force grid > 1),
    # exercised through the feature-major API (no wrapper transposes).
    N2 = 1000
    num_prop2 = jax.random.normal(k_x2, (N2, 5), jnp.float32)
    out2_fb = jax.block_until_ready(
        num_encoder_forward_fb(num_prop2.T, params, tn=256))
    ref2 = reference_forward(num_prop2, params)
    assert out2_fb.shape == (8, N2)
    assert jnp.allclose(out2_fb.T, ref2, atol=1e-5, rtol=1e-5), "mismatch vs reference (ragged)"

    print("KERNEL_OK")
</pallas_src>

<mosaic_0001>
module attributes {stable_mosaic.version = 11 : i64} {
  func.func @num_encoder_kernel(%arg0: i32, %arg1: memref<5x16xf32, #tpu.memory_space<vmem>>, %arg2: memref<8x5xf32, #tpu.memory_space<vmem>>, %arg3: memref<8x1xf32, #tpu.memory_space<vmem>>, %arg4: memref<8x16xf32, #tpu.memory_space<vmem>>) attributes {dimension_semantics = [#tpu.dimension_semantics<parallel>], iteration_bounds = array<i64: 1>, scalar_prefetch = 0 : i64, scratch_operands = 0 : i64, tpu.core_type = #tpu.core_type<tc>, window_params = [{transform_indices = @transform_0, window_bounds = array<i64: 5, 16>}, {pipeline_mode = #tpu.pipeline_mode<synchronous>, transform_indices = @transform_1, window_bounds = array<i64: 8, 5>}, {pipeline_mode = #tpu.pipeline_mode<synchronous>, transform_indices = @transform_2, window_bounds = array<i64: 8, 1>}, {transform_indices = @transform_3, window_bounds = array<i64: 8, 16>}]} {
    %c0 = arith.constant 0 : index
    %c0_0 = arith.constant 0 : index
    %0 = vector.load %arg1[%c0, %c0_0] : memref<5x16xf32, #tpu.memory_space<vmem>>, vector<1x16xf32>
    %c0_1 = arith.constant 0 : index
    %c0_2 = arith.constant 0 : index
    %1 = vector.load %arg2[%c0_1, %c0_2] : memref<8x5xf32, #tpu.memory_space<vmem>>, vector<8x1xf32>
    %2 = vector.broadcast %0 : vector<1x16xf32> to vector<8x16xf32>
    %3 = vector.broadcast %1 : vector<8x1xf32> to vector<8x16xf32>
    %4 = arith.mulf %2, %3 : vector<8x16xf32>
    %c1 = arith.constant 1 : index
    %c0_3 = arith.constant 0 : index
    %5 = vector.load %arg1[%c1, %c0_3] : memref<5x16xf32, #tpu.memory_space<vmem>>, vector<1x16xf32>
    %c0_4 = arith.constant 0 : index
    %c1_5 = arith.constant 1 : index
    %6 = vector.load %arg2[%c0_4, %c1_5] : memref<8x5xf32, #tpu.memory_space<vmem>>, vector<8x1xf32>
    %7 = vector.broadcast %5 : vector<1x16xf32> to vector<8x16xf32>
    %8 = vector.broadcast %6 : vector<8x1xf32> to vector<8x16xf32>
    %9 = arith.mulf %7, %8 : vector<8x16xf32>
    %10 = arith.addf %4, %9 : vector<8x16xf32>
    %c2 = arith.constant 2 : index
    %c0_6 = arith.constant 0 : index
    %11 = vector.load %arg1[%c2, %c0_6] : memref<5x16xf32, #tpu.memory_space<vmem>>, vector<1x16xf32>
    %c0_7 = arith.constant 0 : index
    %c2_8 = arith.constant 2 : index
    %12 = vector.load %arg2[%c0_7, %c2_8] : memref<8x5xf32, #tpu.memory_space<vmem>>, vector<8x1xf32>
    %13 = vector.broadcast %11 : vector<1x16xf32> to vector<8x16xf32>
    %14 = vector.broadcast %12 : vector<8x1xf32> to vector<8x16xf32>
    %15 = arith.mulf %13, %14 : vector<8x16xf32>
    %16 = arith.addf %10, %15 : vector<8x16xf32>
    %c3 = arith.constant 3 : index
    %c0_9 = arith.constant 0 : index
    %17 = vector.load %arg1[%c3, %c0_9] : memref<5x16xf32, #tpu.memory_space<vmem>>, vector<1x16xf32>
    %c0_10 = arith.constant 0 : index
    %c3_11 = arith.constant 3 : index
    %18 = vector.load %arg2[%c0_10, %c3_11] : memref<8x5xf32, #tpu.memory_space<vmem>>, vector<8x1xf32>
    %19 = vector.broadcast %17 : vector<1x16xf32> to vector<8x16xf32>
    %20 = vector.broadcast %18 : vector<8x1xf32> to vector<8x16xf32>
    %21 = arith.mulf %19, %20 : vector<8x16xf32>
    %22 = arith.addf %16, %21 : vector<8x16xf32>
    %c4 = arith.constant 4 : index
    %c0_12 = arith.constant 0 : index
    %23 = vector.load %arg1[%c4, %c0_12] : memref<5x16xf32, #tpu.memory_space<vmem>>, vector<1x16xf32>
    %c0_13 = arith.constant 0 : index
    %c4_14 = arith.constant 4 : index
    %24 = vector.load %arg2[%c0_13, %c4_14] : memref<8x5xf32, #tpu.memory_space<vmem>>, vector<8x1xf32>
    %25 = vector.broadcast %23 : vector<1x16xf32> to vector<8x16xf32>
    %26 = vector.broadcast %24 : vector<8x1xf32> to vector<8x16xf32>
    %27 = arith.mulf %25, %26 : vector<8x16xf32>
    %28 = arith.addf %22, %27 : vector<8x16xf32>
    %c0_15 = arith.constant 0 : index
    %c0_16 = arith.constant 0 : index
    %29 = vector.load %arg3[%c0_15, %c0_16] : memref<8x1xf32, #tpu.memory_space<vmem>>, vector<8x1xf32>
    %30 = vector.broadcast %29 : vector<8x1xf32> to vector<8x16xf32>
    %31 = arith.addf %28, %30 : vector<8x16xf32>
    %cst = arith.constant 0.00999999977 : f32
    %32 = vector.broadcast %cst : f32 to vector<8x16xf32>
    %33 = arith.mulf %32, %31 : vector<8x16xf32>
    %34 = arith.maximumf %31, %33 : vector<8x16xf32>
    %c0_17 = arith.constant 0 : index
    %c0_18 = arith.constant 0 : index
    %35 = vector.load %arg4[%c0_17, %c0_18] : memref<8x16xf32, #tpu.memory_space<vmem>>, vector<8x16xf32>
    tpu.vector_store %arg4[%c0_17, %c0_18], %34 {strides = array<i32>} : memref<8x16xf32, #tpu.memory_space<vmem>>, vector<8x16xf32>,
    return
  }
  func.func @transform_0(%arg0: i32) -> (i32, i32) {
    %c0_i32 = arith.constant 0 : i32
    %c0_i32_0 = arith.constant 0 : i32
    return %c0_i32, %arg0 : i32, i32
  }
  func.func @transform_1(%arg0: i32) -> (i32, i32) {
    %c0_i32 = arith.constant 0 : i32
    %c0_i32_0 = arith.constant 0 : i32
    %c0_i32_1 = arith.constant 0 : i32
    return %c0_i32, %c0_i32_0 : i32, i32
  }
  func.func @transform_2(%arg0: i32) -> (i32, i32) {
    %c0_i32 = arith.constant 0 : i32
    %c0_i32_0 = arith.constant 0 : i32
    %c0_i32_1 = arith.constant 0 : i32
    return %c0_i32, %c0_i32_0 : i32, i32
  }
  func.func @transform_3(%arg0: i32) -> (i32, i32) {
    %c0_i32 = arith.constant 0 : i32
    %c0_i32_0 = arith.constant 0 : i32
    return %c0_i32, %arg0 : i32, i32
  }
}

</mosaic_0001>

<bundles_post_ra>
// kernel: tpu_custom_call.1
= control target key start
LH: loop header
LB: loop body
LE: loop exit
PB: predicated region body
PF: predicated region fallthrough
CT: control target
= control target key end

     0   :  { %8 = vsyncpa [#allocation3], 0  ;;  %s222_s0 = inlined_call_operand.vmem [shape: f32[5,16], index: 0, kind: input, shape index: {}]   ;;  %s223_s1 = inlined_call_operand.hbm [shape: f32[8,5], index: 1, kind: input, shape index: {}]   ;;  %s224_s2 = inlined_call_operand.vmem [shape: f32[8,1], index: 2, kind: input, shape index: {}]   ;;  %s225_s3 = inlined_call_operand.hbm [shape: f32[8,16], index: 3, kind: output, shape index: {}]  }
   0x1   :  { %9 = vsyncpa [#allocation4], 0  ;;  %s171_s12 = smov [#allocation2]  }
   0x2   :  { %s18_s13 = sshll.u32 %s171_s12, 4  ;;  %s19_s13 = int_to_ptr.vmem [resolvable:$true] %s18_s13 }
   0x3   :  { %s135_s14 = scalar_lea.vmem %s19_s13, 128  ;;  %p140_p1 = scmp.lt.s32.totalorder %s19_s13, %s19_s13 }
   0x4   :  { %p136_p0 = scmp.ne.s32.totalorder %s19_s13, %s135_s14  ;;  %p141_p2 = scmp.lt.s32.totalorder %s135_s14, %s135_s14 }
   0x6   :  { %p142_p3 = por %p141_p2, %p140_p1 }
   0x8   :  { %p143_p4 = pnand %p142_p3, %p136_p0 }
   0xa   :  { %146 = shalt.err (!%p143_p4)
}
   0xb   :  { %21 = dma.hbm_to_vmem [thread:$0]  %s223_s1, 128, %s19_s13, [#allocation3]  }
   0xc   :  { %167 = dma.done.wait [#allocation3], 128  }
   0xd   :  { %168 = vsyncadd [#allocation3], 4294967168  ;;  %v172_v0 = vmov 0   ;;  %v173_v1 = vmov 2   ;;  %v28_v2 = vld [vmem:[#allocation2] sm:$0xff]  ;;  %v174_v3 = vmov 1  }
   0xe   :  { %121 = vset.pattern.permute.xlu0 %v172_v0  ;;  %123 = vset.pattern.permute.xlu1 %v173_v1  ;;  %v175_v4 = vmov 3   ;;  %v83_v5 = vld [vmem:[%s224_s2] sm:$0xff]  ;;  %v176_v6 = vmov 4   ;;  %s177_s27 = smov [#allocation5]   ;;  %vm92_vm0 = vcmask 130048  }
   0xf   :  { %35 = vperm.xlu0 %121, %v28_v2   ;;  %56 = vperm.xlu1 %123, %v28_v2   ;;  %v109_v9 = vld [vmem:[%s222_s0] ss:$0 sm:$0xff]  ;;  %v110_v10 = vld [vmem:[%s222_s0 + $0x1] ss:$0 sm:$0xff]  ;;  %v111_v11 = vld [vmem:[%s222_s0 + $0x2] ss:$0 sm:$0xff] }
  0x10   :  { %v112_v16 = vld [vmem:[%s222_s0 + $0x3] ss:$0 sm:$0xff]  ;;  %v113_v19 = vld [vmem:[%s222_s0 + $0x4] ss:$0 sm:$0xff]  ;;  %s100_s28 = sshll.u32 %s177_s27, 4  ;;  %s101_s28 = int_to_ptr.vmem [resolvable:$true] %s100_s28 }
  0x11   :  { %s147_s29 = scalar_lea.vmem %s101_s28, 128  ;;  %p152_p6 = scmp.lt.s32.totalorder %s101_s28, %s101_s28 }
  0x12   :  { %p148_p5 = scmp.ne.s32.totalorder %s101_s28, %s147_s29  ;;  %p153_p7 = scmp.lt.s32.totalorder %s147_s29, %s147_s29 }
  0x13   :  { %122 = vset.pattern.permute.xlu0 %v174_v3  ;;  %124 = vset.pattern.permute.xlu1 %v175_v4 }
  0x14   :  { %45 = vperm.xlu0 %122, %v28_v2   ;;  %67 = vperm.xlu1 %124, %v28_v2   ;;  %p154_p8 = por %p153_p7, %p152_p6 }
  0x16   :  { %p155_p9 = pnand %p154_p8, %p148_p5 }
  0x18   :  { %125 = vset.pattern.permute.xlu1 %v176_v6  ;;  %126 = vset.pattern.permute.xlu0 %v172_v0 }
  0x19   :  { %78 = vperm.xlu1 %125, %v28_v2   ;;  %86 = vperm.xlu0 %126, %v83_v5  }
  0x8a   :  { %v36_v7 = vpop.permute.xlu0 %35  ;;  %v57_v8 = vpop.permute.xlu1 %56 }
  0x8b   :  { %v38_v14 = vmul.f32 %v109_v9, %v36_v7  ;;  %v59_v17 = vmul.f32 %v111_v11, %v57_v8 }
  0x8f   :  { %v46_v12 = vpop.permute.xlu0 %45  ;;  %v68_v13 = vpop.permute.xlu1 %67 }
  0x90   :  { %v48_v15 = vmul.f32 %v110_v10, %v46_v12  ;;  %v70_v21 = vmul.f32 %v112_v16, %v68_v13 }
  0x92   :  { %v49_v18 = vadd.f32 %v48_v15, %v38_v14 }
  0x94   :  { %v60_v20 = vadd.f32 %v59_v17, %v49_v18  ;;  %v79_v22 = vpop.permute.xlu1 %78  ;;  %v87_v25 = vpop.permute.xlu0 %86 }
  0x95   :  { %v81_v23 = vmul.f32 %v113_v19, %v79_v22 }
  0x96   :  { %v71_v24 = vadd.f32 %v70_v21, %v60_v20 }
  0x98   :  { %v82_v26 = vadd.f32 %v81_v23, %v71_v24 }
  0x9a   :  { %v89_v27 = vadd.f32 %v87_v25, %v82_v26 }
  0x9c   :  { %v90_v28 = vmul.f32 0.01, %v89_v27 }
  0x9e   :  { %v91_v29 = vmax.f32 %v89_v27, %v90_v28 }
  0xa0   :  { %93 = vst.msk [vmem:[#allocation5] sm:$0xff] %vm92_vm0, %v91_v29 }
  0xa1   :  { %158 = shalt.err (!%p155_p9)
}
  0xa2   :  { %103 = dma.vmem_to_hbm [thread:$0]  %s101_s28, 128, %s225_s3, [#allocation4]  }
  0xa3   :  { %169 = dma.done.wait [#allocation4], 128  }
  0xa4   :  { %170 = vsyncadd [#allocation4], 4294967168 }
  0xa5   :  { %107 = vsyncpa [#allocation3], 1 }
  0xa6   :  { %108 = vsyncpa [#allocation4], 1 }

</bundles_post_ra>
